<compile_context>
chip_gen: v7x
topology: tpu7x:2x2x1
jax: 0.10.0
libtpu: 0.0.40
codegen_flags: <defaults>
</compile_context>

<pallas_src>
import functools

import jax
import jax.numpy as jnp
from jax import lax
from jax.experimental import pallas as pl
from jax.experimental.pallas import tpu as pltpu

BN_EPS = 1e-5  # nn.BatchNorm2d default


def _block_kernel(x_ref, wexp_ref, fold_ref, unfold_ref, gb_ref, out_ref, *, img_h):
    # x_ref     : (N*H, W*Cin)       f32  folded input rows (lane = w*Cin + ci)
    # wexp_ref  : (3, W*Cin, W*Cout) bf16 expanded conv weight, one K-slab per dy tap
    # fold_ref  : (W*Cout, Cout)     f32  one-hot: lane (w*Cout + co) -> channel co
    # unfold_ref: (Cout, W*Cout)     f32  transpose of fold (channel -> lane broadcast)
    # gb_ref    : (2, Cout)          f32  row 0 = BN gamma, row 1 = BN beta
    # out_ref   : (N*H, W*Cout)      f32  conv + BN + ReLU, lane-dense folded layout
    NH = x_ref.shape[0]
    WCout = out_ref.shape[-1]
    Cout = gb_ref.shape[-1]
    W = WCout // Cout

    x = x_ref[...]

    # Vertical (H) conv taps: shift the resident rows by +-1 on the sublane axis
    # (XLU roll, free slot vs. the MXU) and zero the rows that fall outside each image
    # (this is the H zero-padding).  No VMEM copies, no lane-misaligned concat.
    h = lax.broadcasted_iota(jnp.int32, x.shape, 0) % img_h
    x_up = jnp.where(h != 0, pltpu.roll(x, 1, 0), 0.0)                 # source row h-1
    x_dn = jnp.where(h != img_h - 1, pltpu.roll(x, NH - 1, 0), 0.0)    # source row h+1

    # Whole 3x3 conv (stride 1, pad 1, no bias) as three accumulating MXU matmuls,
    # bf16 operands with f32 accumulation, producing the lane-dense folded layout
    # acc[(n,h), w*Cout + co] directly (horizontal taps + the W zero-padding are baked
    # into the static zero structure of wexp).
    acc = jnp.dot(x_up.astype(jnp.bfloat16), wexp_ref[0],
                  preferred_element_type=jnp.float32)
    acc += jnp.dot(x.astype(jnp.bfloat16), wexp_ref[1],
                   preferred_element_type=jnp.float32)
    acc += jnp.dot(x_dn.astype(jnp.bfloat16), wexp_ref[2],
                   preferred_element_type=jnp.float32)

    # Train-mode BatchNorm2d statistics over (N, H, W), per output channel.
    # One fold matmul on the stacked [sum; sum_sq] rows -> (2, Cout).
    # NOTE: single-pass var = E[x^2] - mean^2 in f32; a two-pass/Welford reduction is
    # safer for activations with large means, at the cost of extra serial MXU trips.
    cnt = jnp.float32(NH * W)
    s12 = jnp.concatenate(
        [jnp.sum(acc, axis=0, keepdims=True),
         jnp.sum(acc * acc, axis=0, keepdims=True)], axis=0)                 # (2, W*Cout)
    stats = jnp.dot(s12, fold_ref[...], preferred_element_type=jnp.float32)  # (2, Cout)
    mean = stats[0:1, :] / cnt
    var = stats[1:2, :] / cnt - mean * mean                                  # biased
    scale = gb_ref[0:1, :] * lax.rsqrt(var + BN_EPS)                         # (1, Cout)
    shift = gb_ref[1:2, :] - mean * scale                                    # (1, Cout)

    # One unfold matmul broadcasting the stacked [scale; shift] back onto (w, co) lanes.
    ss = jnp.dot(jnp.concatenate([scale, shift], axis=0), unfold_ref[...],
                 preferred_element_type=jnp.float32)                         # (2, W*Cout)

    # BN affine + ReLU; full-width lane-dense unmasked store.
    out_ref[...] = jnp.maximum(acc * ss[0:1, :] + ss[1:2, :], 0.0)


def prepare_block_params(w_oihw, gamma, beta, width):
    """Constant operands; compute ONCE per weight update, not per forward call."""
    Cout, Cin, KH, KW = w_oihw.shape
    assert (KH, KW) == (3, 3)
    W = width
    w_hwio = jnp.transpose(w_oihw, (2, 3, 1, 0)).astype(jnp.float32)     # (3,3,Cin,Cout)

    # Expanded weight: wexp[dy, wi*Cin+ci, w*Cout+co] = w_hwio[dy, wi-w+1, ci, co]
    # when 0 <= wi-w+1 < 3 else 0 (the zeros implement the horizontal padding).
    # TODO(synk): for large W switch to a W-tiled, 9*Cin-deep im2col matmul; this
    # expanded weight is O(W^2) and only sensible while W*Cout stays ~128 lanes.
    w_exp = sum(
        jnp.einsum('uw,dic->duiwc',
                   jnp.eye(W, k=1 - dx, dtype=jnp.float32), w_hwio[:, dx])
        for dx in range(3))
    w_exp = w_exp.reshape(3, W * Cin, W * Cout).astype(jnp.bfloat16)

    fold = jnp.tile(jnp.eye(Cout, dtype=jnp.float32), (W, 1))            # (W*Cout, Cout)
    unfold = fold.T                                                       # (Cout, W*Cout)
    gb = jnp.stack([gamma.astype(jnp.float32), beta.astype(jnp.float32)], axis=0)
    return w_exp, fold, unfold, gb


@jax.jit
def block_forward(x_nchw, w_exp, fold, unfold, gb):
    """Forward of `Block` for NCHW input x; constants come from prepare_block_params."""
    N, Cin, H, W = x_nchw.shape
    Cout = gb.shape[1]
    WCout = W * Cout

    # Layout glue: one fused transpose+reshape to the folded (N*H, W*Cin) layout.
    # TODO(synk): in a real pipeline keep activations in this folded layout between
    # layers (avoiding NCHW<->folded HBM relayouts around every block) and, on v7x,
    # add a parallel grid over row blocks with a two-phase (partial-sum + finalize) BN.
    x_rows = jnp.transpose(x_nchw, (0, 2, 3, 1)).astype(jnp.float32).reshape(
        N * H, W * Cin)

    # VMEM budget derived from the actual resident buffers (plus slack); kept well
    # under v7x's 64 MiB physical / 32 MiB default scoped VMEM.
    footprint = (x_rows.size * 4 + w_exp.size * 2 + fold.size * 4 + unfold.size * 4
                 + gb.size * 4 + N * H * WCout * 4)
    vmem_limit = int(min(32 * 1024 * 1024, max(8 * 1024 * 1024, 4 * footprint)))

    out_folded = pl.pallas_call(
        functools.partial(_block_kernel, img_h=H),
        out_shape=jax.ShapeDtypeStruct((N * H, WCout), jnp.float32),
        in_specs=[pl.BlockSpec(memory_space=pltpu.MemorySpace.VMEM)] * 5,
        out_specs=pl.BlockSpec(memory_space=pltpu.MemorySpace.VMEM),
        compiler_params=pltpu.CompilerParams(vmem_limit_bytes=vmem_limit),
    )(x_rows, w_exp, fold, unfold, gb)

    # Un-fold the lane-dense output (cheap reshape) and return to the module's NCHW.
    out_nhwc = out_folded.reshape(N, H, W, Cout)
    return jnp.transpose(out_nhwc, (0, 3, 1, 2))


def _reference_forward(x_nchw, w_oihw, gamma, beta):
    """Pure-JAX reference (conv + train-mode BN + ReLU) for validation."""
    x = jnp.transpose(x_nchw, (0, 2, 3, 1)).astype(jnp.float32)
    w = jnp.transpose(w_oihw, (2, 3, 1, 0)).astype(jnp.float32)
    conv = lax.conv_general_dilated(
        x, w, window_strides=(1, 1), padding=((1, 1), (1, 1)),
        dimension_numbers=("NHWC", "HWIO", "NHWC"))
    mean = jnp.mean(conv, axis=(0, 1, 2), keepdims=True)
    var = jnp.mean((conv - mean) ** 2, axis=(0, 1, 2), keepdims=True)
    y = (conv - mean) * lax.rsqrt(var + BN_EPS) * gamma + beta
    y = jnp.maximum(y, 0.0)
    return jnp.transpose(y, (0, 3, 1, 2))


if __name__ == "__main__":
    # Small shapes consistent with Block(in_channels=4, out_channels=8).
    N, Cin, Cout, H, W = 2, 4, 8, 16, 16

    key = jax.random.PRNGKey(0)
    kx, kw, kg, kb = jax.random.split(key, 4)
    x = jax.random.normal(kx, (N, Cin, H, W), jnp.float32)
    w = jax.random.normal(kw, (Cout, Cin, 3, 3), jnp.float32) * 0.1   # Conv2d weight OIHW
    gamma = 1.0 + 0.1 * jax.random.normal(kg, (Cout,), jnp.float32)   # BN weight
    beta = 0.1 * jax.random.normal(kb, (Cout,), jnp.float32)          # BN bias
    # TODO(synk): BatchNorm running-stat updates (a training side effect) are not modeled.

    # Constants built once (per weight update), reused by every forward call.
    w_exp, fold, unfold, gb = prepare_block_params(w, gamma, beta, W)

    out = jax.block_until_ready(block_forward(x, w_exp, fold, unfold, gb))
    ref = jax.block_until_ready(_reference_forward(x, w, gamma, beta))

    assert out.shape == (N, Cout, H, W)
    # bf16 MXU operands -> looser tolerance than the pure-f32 reference.
    assert jnp.allclose(out, ref, atol=5e-2, rtol=5e-2), "mismatch vs JAX reference"
    print("KERNEL_OK")
</pallas_src>

<mosaic_0001>
module attributes {stable_mosaic.version = 11 : i64} {
  func.func @_block_kernel(%arg0: memref<32x64xf32, #tpu.memory_space<vmem>>, %arg1: memref<3x64x128xbf16, #tpu.memory_space<vmem>>, %arg2: memref<128x8xf32, #tpu.memory_space<vmem>>, %arg3: memref<8x128xf32, #tpu.memory_space<vmem>>, %arg4: memref<2x8xf32, #tpu.memory_space<vmem>>, %arg5: memref<32x128xf32, #tpu.memory_space<vmem>>) attributes {dimension_semantics = [], scalar_prefetch = 0 : i64, scratch_operands = 0 : i64, tpu.core_type = #tpu.core_type<tc>} {
    %c0 = arith.constant 0 : index
    %c0_0 = arith.constant 0 : index
    %0 = vector.load %arg0[%c0, %c0_0] : memref<32x64xf32, #tpu.memory_space<vmem>>, vector<32x64xf32>
    %1 = tpu.iota {dimensions = array<i32: 0>} : vector<32x64xi32>
    %c16_i32 = arith.constant 16 : i32
    %c0_i32 = arith.constant 0 : i32
    %2 = arith.cmpi eq, %c16_i32, %c0_i32 : i32
    %c1_i32 = arith.constant 1 : i32
    %3 = arith.select %2, %c1_i32, %c16_i32 : i32
    %4 = vector.broadcast %3 : i32 to vector<32x64xi32>
    %5 = arith.remsi %1, %4 : vector<32x64xi32>
    %c0_i32_1 = arith.constant 0 : i32
    %6 = vector.broadcast %c0_i32_1 : i32 to vector<32x64xi32>
    %7 = arith.cmpi ne, %5, %6 : vector<32x64xi32>
    %c0_i32_2 = arith.constant 0 : i32
    %8 = vector.broadcast %c0_i32_2 : i32 to vector<32x64xi32>
    %9 = arith.cmpi slt, %5, %8 : vector<32x64xi32>
    %c0_i32_3 = arith.constant 0 : i32
    %10 = arith.cmpi slt, %3, %c0_i32_3 : i32
    %11 = vector.broadcast %10 : i1 to vector<32x64xi1>
    %12 = vector.broadcast %11 : vector<32x64xi1> to vector<32x64xi1>
    %13 = arith.xori %9, %12 : vector<32x64xi1>
    %14 = arith.andi %13, %7 : vector<32x64xi1>
    %15 = vector.broadcast %3 : i32 to vector<32x64xi32>
    %16 = arith.addi %5, %15 : vector<32x64xi32>
    %17 = arith.select %14, %16, %5 : vector<32x64xi1>, vector<32x64xi32>
    %c0_i32_4 = arith.constant 0 : i32
    %18 = vector.broadcast %c0_i32_4 : i32 to vector<32x64xi32>
    %19 = arith.cmpi ne, %17, %18 : vector<32x64xi32>
    %c1_i32_5 = arith.constant 1 : i32
    %20 = tpu.dynamic_rotate %0 by %c1_i32_5 dim 0 : vector<32x64xf32>, i32 -> vector<32x64xf32>
    %cst = arith.constant 0.000000e+00 : f32
    %21 = vector.broadcast %cst : f32 to vector<32x64xf32>
    %22 = arith.select %19, %20, %21 : vector<32x64xi1>, vector<32x64xf32>
    %c15_i32 = arith.constant 15 : i32
    %23 = vector.broadcast %c15_i32 : i32 to vector<32x64xi32>
    %24 = arith.cmpi ne, %17, %23 : vector<32x64xi32>
    %c31_i32 = arith.constant 31 : i32
    %25 = tpu.dynamic_rotate %0 by %c31_i32 dim 0 : vector<32x64xf32>, i32 -> vector<32x64xf32>
    %cst_6 = arith.constant 0.000000e+00 : f32
    %26 = vector.broadcast %cst_6 : f32 to vector<32x64xf32>
    %27 = arith.select %24, %25, %26 : vector<32x64xi1>, vector<32x64xf32>
    %28 = arith.truncf %22 : vector<32x64xf32> to vector<32x64xbf16>
    %c0_7 = arith.constant 0 : index
    %c0_8 = arith.constant 0 : index
    %c0_9 = arith.constant 0 : index
    %29 = vector.load %arg1[%c0_7, %c0_8, %c0_9] : memref<3x64x128xbf16, #tpu.memory_space<vmem>>, vector<1x64x128xbf16>
    %30 = vector.shape_cast %29 : vector<1x64x128xbf16> to vector<64x128xbf16>
    %cst_10 = arith.constant dense<0.000000e+00> : vector<32x128xf32>
    %31 = tpu.matmul %28, %30, %cst_10 {dimension_numbers = #tpu.dot_dimension_numbers<[1], [0], [0], [1], [0, 0, 1, 1], [], []>} : vector<32x64xbf16>, vector<64x128xbf16>, vector<32x128xf32> -> vector<32x128xf32>
    %32 = arith.truncf %0 : vector<32x64xf32> to vector<32x64xbf16>
    %c1 = arith.constant 1 : index
    %c0_11 = arith.constant 0 : index
    %c0_12 = arith.constant 0 : index
    %33 = vector.load %arg1[%c1, %c0_11, %c0_12] : memref<3x64x128xbf16, #tpu.memory_space<vmem>>, vector<1x64x128xbf16>
    %34 = vector.shape_cast %33 : vector<1x64x128xbf16> to vector<64x128xbf16>
    %cst_13 = arith.constant dense<0.000000e+00> : vector<32x128xf32>
    %35 = tpu.matmul %32, %34, %cst_13 {dimension_numbers = #tpu.dot_dimension_numbers<[1], [0], [0], [1], [0, 0, 1, 1], [], []>} : vector<32x64xbf16>, vector<64x128xbf16>, vector<32x128xf32> -> vector<32x128xf32>
    %36 = arith.addf %31, %35 : vector<32x128xf32>
    %37 = arith.truncf %27 : vector<32x64xf32> to vector<32x64xbf16>
    %c2 = arith.constant 2 : index
    %c0_14 = arith.constant 0 : index
    %c0_15 = arith.constant 0 : index
    %38 = vector.load %arg1[%c2, %c0_14, %c0_15] : memref<3x64x128xbf16, #tpu.memory_space<vmem>>, vector<1x64x128xbf16>
    %39 = vector.shape_cast %38 : vector<1x64x128xbf16> to vector<64x128xbf16>
    %cst_16 = arith.constant dense<0.000000e+00> : vector<32x128xf32>
    %40 = tpu.matmul %37, %39, %cst_16 {dimension_numbers = #tpu.dot_dimension_numbers<[1], [0], [0], [1], [0, 0, 1, 1], [], []>} : vector<32x64xbf16>, vector<64x128xbf16>, vector<32x128xf32> -> vector<32x128xf32>
    %41 = arith.addf %36, %40 : vector<32x128xf32>
    %cst_17 = arith.constant dense<0.000000e+00> : vector<128xf32>
    %42 = vector.multi_reduction <add>, %41, %cst_17 [0] : vector<32x128xf32> to vector<128xf32>
    %43 = vector.shape_cast %42 : vector<128xf32> to vector<1x128xf32>
    %44 = arith.mulf %41, %41 : vector<32x128xf32>
    %cst_18 = arith.constant dense<0.000000e+00> : vector<128xf32>
    %45 = vector.multi_reduction <add>, %44, %cst_18 [0] : vector<32x128xf32> to vector<128xf32>
    %46 = vector.shape_cast %45 : vector<128xf32> to vector<1x128xf32>
    %47 = tpu.concatenate %43, %46 in 0 : vector<1x128xf32>, vector<1x128xf32> -> vector<2x128xf32>
    %c0_19 = arith.constant 0 : index
    %c0_20 = arith.constant 0 : index
    %48 = vector.load %arg2[%c0_19, %c0_20] : memref<128x8xf32, #tpu.memory_space<vmem>>, vector<128x8xf32>
    %cst_21 = arith.constant dense<0.000000e+00> : vector<2x8xf32>
    %49 = tpu.matmul %47, %48, %cst_21 {dimension_numbers = #tpu.dot_dimension_numbers<[1], [0], [0], [1], [0, 0, 1, 1], [], []>} : vector<2x128xf32>, vector<128x8xf32>, vector<2x8xf32> -> vector<2x8xf32>
    %50 = vector.extract_strided_slice %49 {offsets = [0, 0], sizes = [1, 8], strides = [1, 1]} : vector<2x8xf32> to vector<1x8xf32>
    %cst_22 = arith.constant 5.120000e+02 : f32
    %51 = vector.broadcast %cst_22 : f32 to vector<1x8xf32>
    %52 = arith.divf %50, %51 : vector<1x8xf32>
    %53 = vector.extract_strided_slice %49 {offsets = [1, 0], sizes = [1, 8], strides = [1, 1]} : vector<2x8xf32> to vector<1x8xf32>
    %cst_23 = arith.constant 5.120000e+02 : f32
    %54 = vector.broadcast %cst_23 : f32 to vector<1x8xf32>
    %55 = arith.divf %53, %54 : vector<1x8xf32>
    %56 = arith.mulf %52, %52 : vector<1x8xf32>
    %57 = arith.subf %55, %56 : vector<1x8xf32>
    %c0_24 = arith.constant 0 : index
    %c0_25 = arith.constant 0 : index
    %58 = vector.load %arg4[%c0_24, %c0_25] : memref<2x8xf32, #tpu.memory_space<vmem>>, vector<1x8xf32>
    %cst_26 = arith.constant 9.99999974E-6 : f32
    %59 = vector.broadcast %cst_26 : f32 to vector<1x8xf32>
    %60 = arith.addf %57, %59 : vector<1x8xf32>
    %61 = math.rsqrt %60 : vector<1x8xf32>
    %62 = arith.mulf %58, %61 : vector<1x8xf32>
    %c1_27 = arith.constant 1 : index
    %c0_28 = arith.constant 0 : index
    %63 = vector.load %arg4[%c1_27, %c0_28] : memref<2x8xf32, #tpu.memory_space<vmem>>, vector<1x8xf32>
    %64 = arith.mulf %52, %62 : vector<1x8xf32>
    %65 = arith.subf %63, %64 : vector<1x8xf32>
    %66 = tpu.concatenate %62, %65 in 0 : vector<1x8xf32>, vector<1x8xf32> -> vector<2x8xf32>
    %c0_29 = arith.constant 0 : index
    %c0_30 = arith.constant 0 : index
    %67 = vector.load %arg3[%c0_29, %c0_30] : memref<8x128xf32, #tpu.memory_space<vmem>>, vector<8x128xf32>
    %cst_31 = arith.constant dense<0.000000e+00> : vector<2x128xf32>
    %68 = tpu.matmul %66, %67, %cst_31 {dimension_numbers = #tpu.dot_dimension_numbers<[1], [0], [0], [1], [0, 0, 1, 1], [], []>} : vector<2x8xf32>, vector<8x128xf32>, vector<2x128xf32> -> vector<2x128xf32>
    %69 = vector.extract_strided_slice %68 {offsets = [0, 0], sizes = [1, 128], strides = [1, 1]} : vector<2x128xf32> to vector<1x128xf32>
    %70 = vector.broadcast %69 : vector<1x128xf32> to vector<32x128xf32>
    %71 = arith.mulf %41, %70 : vector<32x128xf32>
    %72 = vector.extract_strided_slice %68 {offsets = [1, 0], sizes = [1, 128], strides = [1, 1]} : vector<2x128xf32> to vector<1x128xf32>
    %73 = vector.broadcast %72 : vector<1x128xf32> to vector<32x128xf32>
    %74 = arith.addf %71, %73 : vector<32x128xf32>
    %cst_32 = arith.constant 0.000000e+00 : f32
    %75 = vector.broadcast %cst_32 : f32 to vector<32x128xf32>
    %76 = arith.maximumf %74, %75 : vector<32x128xf32>
    %c0_33 = arith.constant 0 : index
    %c0_34 = arith.constant 0 : index
    %77 = vector.load %arg5[%c0_33, %c0_34] : memref<32x128xf32, #tpu.memory_space<vmem>>, vector<32x128xf32>
    tpu.vector_store %arg5[%c0_33, %c0_34], %76 {strides = array<i32>} : memref<32x128xf32, #tpu.memory_space<vmem>>, vector<32x128xf32>,
    return
  }
}

</mosaic_0001>

<bundles_post_ra>
// kernel: block_forward.1
= control target key start
LH: loop header
LB: loop body
LE: loop exit
PB: predicated region body
PF: predicated region fallthrough
CT: control target
= control target key end

     0   :  { %v25_v0 = vlaneseq  ;;  %v817_v2 = vmov 0.0|0.0   ;;  %vm157_vm0 = vcmask 523264   ;;  %vm818_vm7 = vmmov 0   ;;  %s1031_s1 = inlined_call_operand.vmem [shape: bf16[3,64,128], index: 1, kind: input, shape index: {}]   ;;  %s1032_s0 = inlined_call_operand.vmem [shape: f32[32,64], index: 0, kind: input, shape index: {}]   ;;  %s1033_s2 = inlined_call_operand.vmem [shape: f32[128,8], index: 2, kind: input, shape index: {}]   ;;  %s1034_s3 = inlined_call_operand.vmem [shape: f32[8,128], index: 3, kind: input, shape index: {}]   ;;  %s1035_s4 = inlined_call_operand.vmem [shape: f32[2,8], index: 4, kind: input, shape index: {}]   ;;  %s1036_s5 = inlined_call_operand.vmem [shape: f32[32,128], index: 5, kind: output, shape index: {}]  }
   0x1   :  { %v803_v1 = vld [vmem:[%s1031_s1 + $0x20] sm:$0xff]   ;;  %768 = vmatprep.subr.bf16.mxu1 %v817_v2  ;;  %v804_v3 = vld [vmem:[%s1031_s1 + $0x28] sm:$0xff]   ;;  %v805_v5 = vld [vmem:[%s1031_s1 + $0x30] sm:$0xff]   ;;  %vm408_vm8 = vcmask 1040384   ;;  %vm518_vm9 = vcmask 64512  }
   0x2   :  { %v857_v4 = vshrl.u32 %v25_v0, 7  ;;  %692 = vmatprep.subr.bf16.mxu0 %v803_v1  ;;  %v865_v6 = vld [vmem:[%s1032_s0] sm:$0xff]  ;;  %v870_v7 = vld [vmem:[%s1032_s0 + $0x8] sm:$0xff]  ;;  %v879_v11 = vld [vmem:[%s1032_s0 + $0x18] sm:$0xff] }
   0x3   :  { %693 = vmatpush3.bf16.msra.mxu0 %v803_v1  ;;  %v82_v8 = vrot.slane %v865_v6, 7  ;;  %v122_v10 = vpack.c.bf16 %v870_v7, %v865_v6  ;;  %v85_v12 = vrot.slane %v879_v11, 7  ;;  %v806_v13 = vld [vmem:[%s1031_s1 + $0x38] sm:$0xff]   ;;  %v83_v14 = vrot.slane %v870_v7, 7  ;;  %v893_v16 = vld [vmem:[%s1032_s0 + $0x10] sm:$0xff]  ;;  %v807_v17 = vld [vmem:[%s1031_s1] sm:$0xff]  }
   0x4   :  { %694 = vmatprep.subr.bf16.mxu0 %v804_v3  ;;  %v34_v9 = vand.u32 15, %v857_v4  ;;  %vm86_vm1 = vcmp.lt.s32.totalorder %v857_v4, 1  ;;  %v123_v20 = vpack.c.bf16 %v879_v11, %v893_v16  ;;  %v410_v21 = vld [vmem:[%s1033_s2] sm:$0xff]  ;;  %v411_v23 = vld [vmem:[%s1033_s2 + $0x8] sm:$0xff]  ;;  %v412_v24 = vld [vmem:[%s1033_s2 + $0x10] sm:$0xff]  ;;  %v28_v27 = vadd.s32 16, %v857_v4 }
   0x5   :  { %700 = vmatprep.mubr.msk.bf16.mxu0 %vm157_vm0, %v122_v10  ;;  %v90_v15 = vsel %vm86_vm1, %v85_v12, %v82_v8  ;;  %v89_v18 = vsel %vm86_vm1, %v82_v8, %v83_v14  ;;  %v413_v25 = vld [vmem:[%s1033_s2 + $0x18] sm:$0xff]  ;;  %v808_v26 = vld [vmem:[%s1031_s1 + $0x8] sm:$0xff]   ;;  %v769_v28 = vpack.c.bf16 %v411_v23, %v410_v21  ;;  %v27_v29 = vadd.s32 8, %v857_v4  ;;  %v809_v32 = vld [vmem:[%s1031_s1 + $0x10] sm:$0xff]  }
   0x6   :  { %vm78_vm2 = vcmp.ne.s32.totalorder %v34_v9, 0  ;;  %v772_v30 = vpack.c.bf16 %v413_v25, %v412_v24  ;;  %v84_v31 = vrot.slane %v893_v16, 7  ;;  %v48_v33 = vand.u32 15, %v28_v27  ;;  %v810_v38 = vld [vmem:[%s1031_s1 + $0x18] sm:$0xff]   ;;  %v811_v43 = vld [vmem:[%s1031_s1 + $0x40] sm:$0xff]   ;;  %v812_v48 = vld [vmem:[%s1031_s1 + $0x48] sm:$0xff]  }
   0x7   :  { %695 = vmatpush3.bf16.msra.mxu0 %v804_v3  ;;  %v91_v19 = vsel %vm78_vm2, %v90_v15, 0.0  ;;  %770 = vmatpush3.bf16.msra.mxu1 %v769_v28  ;;  %v100_v34 = vrot.slane %v870_v7, 1  ;;  %v101_v35 = vrot.slane %v893_v16, 1  ;;  %v41_v36 = vand.u32 15, %v27_v29  ;;  %v813_v51 = vld [vmem:[%s1031_s1 + $0x50] sm:$0xff]   ;;  %v814_v53 = vld [vmem:[%s1031_s1 + $0x58] sm:$0xff]  }
   0x8   :  { %696 = vmatprep.subr.bf16.mxu0 %v805_v5  ;;  %v112_v22 = vpack.c.bf16 %v89_v18, %v91_v19  ;;  %771 = vmatprep.subr.bf16.mxu1 %v817_v2  ;;  %vm103_vm3 = vcmp.lt.s32.totalorder %v857_v4, 7  ;;  %v99_v37 = vrot.slane %v865_v6, 1  ;;  %vm80_vm4 = vcmp.ne.s32.totalorder %v48_v33, 0  ;;  %v414_v58 = vld [vmem:[%s1033_s2 + $0x20] sm:$0xff]  ;;  %v415_v59 = vld [vmem:[%s1033_s2 + $0x28] sm:$0xff]  ;;  %v416_v61 = vld [vmem:[%s1033_s2 + $0x30] sm:$0xff] }
   0x9   :  { %v88_v39 = vsel %vm86_vm1, %v83_v14, %v84_v31  ;;  %vm96_vm5 = vcmp.ne.s32.totalorder %v41_v36, 15  ;;  %v105_v40 = vsel %vm103_vm3, %v100_v34, %v101_v35  ;;  %v87_v41 = vsel %vm86_vm1, %v84_v31, %v85_v12  ;;  %v417_v62 = vld [vmem:[%s1033_s2 + $0x38] sm:$0xff]  ;;  %v418_v0 = vld [vmem:[%s1033_s2 + $0x40] sm:$0xff]  ;;  %v419_v1 = vld [vmem:[%s1033_s2 + $0x48] sm:$0xff] }
   0xa   :  { %v93_v42 = vsel %vm80_vm4, %v88_v39, 0.0  ;;  %v106_v44 = vsel %vm103_vm3, %v99_v37, %v100_v34  ;;  %v109_v45 = vsel %vm96_vm5, %v105_v40, 0.0  ;;  %v29_v49 = vadd.s32 24, %v857_v4  ;;  %v421_v6 = vld [vmem:[%s1033_s2 + $0x58] sm:$0xff]  ;;  %v422_v8 = vld [vmem:[%s1033_s2 + $0x60] sm:$0xff]  ;;  %v423_v9 = vld [vmem:[%s1033_s2 + $0x68] sm:$0xff] }
   0xb   :  { %697 = vmatpush3.bf16.msra.mxu0 %v805_v5  ;;  %773 = vmatpush3.bf16.msra.mxu1 %v772_v30  ;;  %v113_v46 = vpack.c.bf16 %v87_v41, %v93_v42  ;;  %v292_v47 = vpack.c.bf16 %v109_v45, %v106_v44  ;;  %v102_v50 = vrot.slane %v879_v11, 1  ;;  %v775_v60 = vpack.c.bf16 %v415_v59, %v414_v58  ;;  %v420_v5 = vld [vmem:[%s1033_s2 + $0x50] sm:$0xff]  ;;  %v425_v12 = vld [vmem:[%s1033_s2 + $0x78] sm:$0xff]  ;;  %v517_v41 = vld [vmem:[%s1034_s3] sm:$0xff] }
   0xc   :  { %698 = vmatprep.subr.bf16.mxu0 %v806_v13  ;;  %774 = vmatprep.subr.bf16.mxu1 %v817_v2  ;;  %v55_v52 = vand.u32 15, %v29_v49  ;;  %v778_v63 = vpack.c.bf16 %v417_v62, %v416_v61  ;;  %v781_v3 = vpack.c.bf16 %v419_v1, %v418_v0  ;;  %v784_v7 = vpack.c.bf16 %v421_v6, %v420_v5  ;;  %v424_v11 = vld [vmem:[%s1033_s2 + $0x70] sm:$0xff] }
   0xd   :  { %v107_v54 = vsel %vm103_vm3, %v102_v50, %v99_v37  ;;  %v104_v55 = vsel %vm103_vm3, %v101_v35, %v102_v50  ;;  %v787_v10 = vpack.c.bf16 %v423_v9, %v422_v8  ;;  %v790_v14 = vpack.c.bf16 %v425_v12, %v424_v11  ;;  %v503_v50 = vld [vmem:[%s1035_s4] sm:$0x1] }
   0xe   :  { %vm98_vm6 = vcmp.ne.s32.totalorder %v55_v52, 15  ;;  %v594_v58 = vsub.s32 0, %v857_v4  ;;  %v602_v59 = vsub.s32 1, %v857_v4 }
   0xf   :  { %699 = vmatpush3.bf16.msra.mxu0 %v806_v13  ;;  %v111_v56 = vsel %vm98_vm6, %v107_v54, 0.0  ;;  %776 = vmatpush3.bf16.msra.mxu1 %v775_v60  ;;  %v819_v13 = vmov 0.0  }
  0x10   :  { %704 = vmatprep.subr.bf16.mxu0 %v807_v17  ;;  %v293_v57 = vpack.c.bf16 %v111_v56, %v104_v55  ;;  %777 = vmatprep.subr.bf16.mxu1 %v817_v2 }
  0x11   :  { %760 = vmatprep.mubr.msk.f32.mxu1 %vm818_vm7, %v819_v13 }
  0x12   :  { %701 = vmatmul.mubr.msk.bf16.vlgmr.msra.gmra.mrb[0].mxu0 %vm157_vm0, %v123_v20 }
  0x13   :  { %705 = vmatpush3.bf16.msra.mxu0 %v807_v17  ;;  %712 = vmatprep.mubr.msk.bf16.mxu0 %vm157_vm0, %v112_v22 }
  0x14   :  { %706 = vmatprep.subr.bf16.mxu0 %v808_v26  ;;  %779 = vmatpush3.bf16.msra.mxu1 %v778_v63 }
  0x15   :  { %780 = vmatprep.subr.bf16.mxu1 %v817_v2 }
  0x17   :  { %707 = vmatpush3.bf16.msra.mxu0 %v808_v26 }
  0x18   :  { %708 = vmatprep.subr.bf16.mxu0 %v809_v32  ;;  %782 = vmatpush3.bf16.msra.mxu1 %v781_v3 }
  0x19   :  { %783 = vmatprep.subr.bf16.mxu1 %v817_v2 }
  0x1b   :  { %709 = vmatpush3.bf16.msra.mxu0 %v809_v32 }
  0x1c   :  { %710 = vmatprep.subr.bf16.mxu0 %v810_v38  ;;  %785 = vmatpush3.bf16.msra.mxu1 %v784_v7 }
  0x1d   :  { %786 = vmatprep.subr.bf16.mxu1 %v817_v2 }
  0x1f   :  { %711 = vmatpush3.bf16.msra.mxu0 %v810_v38 }
  0x20   :  { %716 = vmatprep.subr.bf16.mxu0 %v811_v43  ;;  %788 = vmatpush3.bf16.msra.mxu1 %v787_v10 }
  0x21   :  { %789 = vmatprep.subr.bf16.mxu1 %v817_v2 }
  0x22   :  { %713 = vmatmul.mubr.msk.bf16.vlgmr.msra.gmra.mrb[0].mxu0 %vm157_vm0, %v113_v46 }
  0x23   :  { %717 = vmatpush3.bf16.msra.mxu0 %v811_v43  ;;  %724 = vmatprep.mubr.msk.bf16.mxu0 %vm157_vm0, %v292_v47 }
  0x24   :  { %718 = vmatprep.subr.bf16.mxu0 %v812_v48  ;;  %791 = vmatpush3.bf16.msra.mxu1 %v790_v14 }
  0x25   :  { %763 = vmatprep.subr.mxu1 %v819_v13 }
  0x27   :  { %719 = vmatpush3.bf16.msra.mxu0 %v812_v48 }
  0x28   :  { %720 = vmatprep.subr.bf16.mxu0 %v813_v51 }
  0x2b   :  { %721 = vmatpush3.bf16.msra.mxu0 %v813_v51 }
  0x2c   :  { %722 = vmatprep.subr.bf16.mxu0 %v814_v53 }
  0x2f   :  { %723 = vmatpush3.bf16.msra.mxu0 %v814_v53  ;;  %v510_v53 = vld [vmem:[%s1035_s4 + $0x1] sm:$0x1] }
  0x32   :  { %725 = vmatmul.mubr.msk.bf16.vlgmr.msra.gmra.mrb[0].mxu0 %vm157_vm0, %v293_v57 }
 0x105   :  { %v726_v15 = vpop.f32.mrb[0].mxu0 }
 0x106   :  { %v367_v16 = vpop.f32.mrb[1].mxu0  ;;  %v397_v22 = vmul.f32 %v726_v15, %v726_v15 }
 0x107   :  { %v727_v17 = vpop.f32.mrb[2].mxu0  ;;  %v395_v19 = vmul.f32 %v367_v16, %v367_v16 }
 0x108   :  { %v370_v18 = vpop.f32.mrb[3].mxu0  ;;  %v398_v25 = vmul.f32 %v727_v17, %v727_v17 }
 0x109   :  { %v386_v20 = vadd.f32 %v370_v18, %v367_v16  ;;  %v396_v21 = vmul.f32 %v370_v18, %v370_v18 }
 0x10b   :  { %v387_v23 = vadd.f32 %v726_v15, %v386_v20  ;;  %v399_v24 = vadd.f32 %v396_v21, %v395_v19 }
 0x10d   :  { %v388_v26 = vadd.f32 %v727_v17, %v387_v23  ;;  %v400_v27 = vadd.f32 %v399_v24, %v397_v22 }
 0x10f   :  { %v389_v28 = vrot.slane %v388_v26, 4  ;;  %v401_v29 = vadd.f32 %v400_v27, %v398_v25 }
 0x111   :  { %v390_v30 = vadd.f32 %v389_v28, %v388_v26  ;;  %v402_v31 = vrot.slane %v401_v29, 4 }
 0x113   :  { %v391_v2 = vrot.slane %v390_v30, 2  ;;  %v403_v32 = vadd.f32 %v402_v31, %v401_v29 }
 0x115   :  { %v392_v33 = vadd.f32 %v391_v2, %v390_v30  ;;  %v404_v34 = vrot.slane %v403_v32, 2 }
 0x117   :  { %v393_v35 = vrot.slane %v392_v33, 1  ;;  %v405_v36 = vadd.f32 %v404_v34, %v403_v32 }
 0x119   :  { %v406_v37 = vrot.slane %v405_v36, 1  ;;  %v394_v38 = vadd.f32 %v393_v35, %v392_v33 }
 0x11b   :  { %v407_v39 = vadd.f32 %v406_v37, %v405_v36 }
 0x11d   :  { %v409_v40 = vsel %vm408_vm8, %v394_v38, %v407_v39 }
 0x11e   :  { %761 = vmatmul.mubr.f32.vlgmr.msra.gmra.mrb[0].mxu1 %v409_v40 }
 0x11f   :  { %765 = vmatprep.mubr.msk.f32.mxu1 %vm818_vm7, %v819_v13  ;;  %764 = vmatpush3.msra.mxu1 %v517_v41 }
 0x1f1   :  { %v492_v42 = vpop.f32.mrb[0].mxu1 }
 0x1f2   :  { %v497_v43 = vmul.f32 0.001953125, %v492_v42  ;;  %v762_v44 = vpop.f32.mrb[1].mxu1 }
 0x1f4   :  { %v498_v45 = vmul.f32 %v497_v43, %v497_v43 }
 0x1f6   :  { %v500_v46 = vrot.slane %v498_v45, 7 }
 0x1f8   :  { %v502_v47 = vsub.f32 %v497_v43, %v500_v46 }
 0x1fa   :  { %v504_v48 = vadd.f32 1e-05, %v502_v47 }
 0x1fc   :  { %815 = vrsqrt.f32 %v504_v48 }
 0x206   :  { %v816_v49 = vpop.eup %815 }
 0x207   :  { %v507_v51 = vrot.slane %v816_v49, 1 }
 0x209   :  { %v509_v52 = vmul.f32 %v507_v51, %v503_v50 }
 0x20b   :  { %v511_v54 = vmul.f32 %v509_v52, %v497_v43 }
 0x20d   :  { %v512_v55 = vsub.f32 %v510_v53, %v511_v54 }
 0x20f   :  { %v514_v56 = vrot.slane %v512_v55, 7 }
 0x211   :  { %v516_v57 = vsel %vm408_vm8, %v509_v52, %v514_v56 }
 0x212   :  { %766 = vmatmul.mubr.msk.f32.vlgmr.msra.gmra.mrb[2].mxu1 %vm518_vm9, %v516_v57 }
 0x2e5   :  { %v588_v60 = vpop.f32.mrb[2].mxu1 }
 0x2e6   :  { %v595_v61 = vrot.slane %v588_v60, %v594_v58  ;;  %v767_v62 = vpop.f32.mrb[3].mxu1  ;;  %v603_v63 = vrot.slane %v588_v60, %v602_v59 }
 0x2e8   :  { %v596_v0 = vmul.f32 %v595_v61, %v367_v16  ;;  %v597_v1 = vmul.f32 %v595_v61, %v370_v18  ;;  %v598_v3 = vmul.f32 %v726_v15, %v595_v61  ;;  %v599_v5 = vmul.f32 %v727_v17, %v595_v61 }
 0x2ea   :  { %v604_v6 = vadd.f32 %v603_v63, %v596_v0  ;;  %v605_v7 = vadd.f32 %v603_v63, %v597_v1  ;;  %v606_v8 = vadd.f32 %v603_v63, %v598_v3  ;;  %v607_v9 = vadd.f32 %v603_v63, %v599_v5 }
 0x2ec   :  { %v608_v10 = vmax.f32 %v604_v6, 0.0  ;;  %v609_v11 = vmax.f32 %v605_v7, 0.0  ;;  %v610_v12 = vmax.f32 %v606_v8, 0.0  ;;  %v611_v13 = vmax.f32 %v607_v9, 0.0 }
 0x2ee   :  { %612 = vst [vmem:[%s1036_s5] sm:$0xff] %v608_v10  ;;  %613 = vst [vmem:[%s1036_s5 + $0x8] sm:$0xff] %v609_v11 }
 0x2ef   :  { %614 = vst [vmem:[%s1036_s5 + $0x10] sm:$0xff] %v610_v12  ;;  %615 = vst [vmem:[%s1036_s5 + $0x18] sm:$0xff] %v611_v13 }

</bundles_post_ra>
